<compile_context>
chip_gen: v5e
topology: v5e:2x2
jax: 0.10.0
libtpu: 0.0.40
codegen_flags: <defaults>
</compile_context>

<pallas_src>
import functools

import jax
import jax.numpy as jnp
from jax.experimental import pallas as pl
from jax.experimental.pallas import tpu as pltpu


def _round_up(x, m):
    return ((x + m - 1) // m) * m


# Per-generation VMEM capacity (queried once; falls back to the v7x 64 MiB
# worst case if the query is unavailable).
try:
    _VMEM_CAP = int(pltpu.get_tpu_info().vmem_capacity_bytes)
except Exception:  # pragma: no cover - conservative fallback
    _VMEM_CAP = 64 << 20


def _bbox_head_kernel(x_ref, w_ref, b_ref, out_ref):
    """Fused cls+reg FC: (TILE_N, D) @ (D, OUT_pad) on the MXU with f32
    accumulation.  x is cast to bf16 in-kernel (no-op if already bf16); the
    bias broadcast-add rides free on the VPU under MXU/DMA slack."""
    x = x_ref[...].astype(jnp.bfloat16)
    out_ref[...] = (
        jnp.dot(x, w_ref[...], preferred_element_type=jnp.float32) + b_ref[...]
    )


def pack_bbox_head_params(w_cls, b_cls, w_reg, b_reg, *, compute_dtype=jnp.bfloat16):
    """One-time (init-time) packing of the two nn.Linear layers.

    w_cls: (n_cls, D), w_reg: (n_reg, D)  -- PyTorch nn.Linear layout.
    Returns:
      w_fused: (D, OUT_pad) compute_dtype, pre-transposed, zero-padded on OUT only
      b_fused: (1, OUT_pad) float32, zero-padded
      n_cls, n_reg, d (Python ints for slicing)
    """
    n_cls, d = w_cls.shape
    n_reg, d2 = w_reg.shape
    assert d == d2, "cls/reg FC layers must share the flattened input dim"

    out = n_cls + n_reg
    out_pad = _round_up(out, 128)

    w = jnp.concatenate(
        [jnp.transpose(w_cls).astype(jnp.float32),
         jnp.transpose(w_reg).astype(jnp.float32)],
        axis=1,
    )                                                      # (D, n_cls+n_reg)
    w = jnp.pad(w, ((0, 0), (0, out_pad - out)))           # zero pad OUT only
    w = w.astype(compute_dtype)

    b = jnp.concatenate(
        [b_cls.reshape(-1).astype(jnp.float32),
         b_reg.reshape(-1).astype(jnp.float32)]
    )
    b = jnp.pad(b, (0, out_pad - out)).reshape(1, out_pad)

    return w, b, int(n_cls), int(n_reg), int(d)


def _pick_tile(n, d, out_pad, x_itemsize, w_itemsize):
    """Largest RoI tile whose footprint (2x streamed x + 2x streamed out +
    single-buffered weight/bias + headroom) fits ~75% of this chip's VMEM."""
    budget = int(_VMEM_CAP * 0.75)
    fixed = d * out_pad * w_itemsize + out_pad * 4 + (2 << 20)
    tile = 1024
    while tile > 128:
        need = 2 * tile * d * x_itemsize + 2 * tile * out_pad * 4 + fixed
        if need <= budget:
            break
        tile //= 2
    # Don't over-allocate for small RoI batches (keep sublane alignment of 8).
    tile = min(tile, max(8, _round_up(n, 8)))
    return tile


@functools.partial(jax.jit, static_argnames=("n_cls", "n_reg", "tile_n"))
def bbox_head_rbbox_forward(x_nchw, w_fused, b_fused, *, n_cls, n_reg, tile_n=None):
    """x_nchw: (N, C, H, W) in f32 or bf16.  w_fused/b_fused from pack_bbox_head_params."""
    n = x_nchw.shape[0]
    d = x_nchw.shape[1] * x_nchw.shape[2] * x_nchw.shape[3]
    d_w, out_pad = w_fused.shape
    assert d == d_w, "flattened input dim must match packed weight"

    # Same row-major flattening as torch .view(N, -1); metadata-only reshape,
    # NO cast and NO padding (cast happens in-kernel, K stays unpadded).
    x = x_nchw.reshape(n, d)

    tile = tile_n if tile_n is not None else _pick_tile(
        n, d, out_pad, x.dtype.itemsize, w_fused.dtype.itemsize)
    grid = (pl.cdiv(n, tile),)   # ragged last tile allowed; no N padding

    # VMEM footprint: double-buffered x/out tiles + single-buffered weight/bias
    # + headroom.  Never clamp below the computed requirement.
    x_bytes = tile * d * x.dtype.itemsize
    o_bytes = tile * out_pad * 4
    w_bytes = d * out_pad * w_fused.dtype.itemsize
    b_bytes = out_pad * 4
    need = 2 * x_bytes + 2 * o_bytes + w_bytes + b_bytes + (2 << 20)
    vmem_bytes = int(min(max(need, 16 << 20), _VMEM_CAP))

    cost = pl.CostEstimate(
        flops=2 * n * d * out_pad,
        transcendentals=0,
        bytes_accessed=(n * d * x.dtype.itemsize
                        + d * out_pad * w_fused.dtype.itemsize
                        + n * out_pad * 4),
    )

    out = pl.pallas_call(
        _bbox_head_kernel,
        out_shape=jax.ShapeDtypeStruct((n, out_pad), jnp.float32),
        grid_spec=pltpu.PrefetchScalarGridSpec(
            num_scalar_prefetch=0,
            grid=grid,
            in_specs=[
                # x tile, streamed (double-buffered by default).
                pl.BlockSpec((tile, d), lambda i: (i, 0)),
                # Fused weight: grid-invariant -> resident, single-buffered.
                pl.BlockSpec((d, out_pad), lambda i: (0, 0),
                             pipeline_mode=pl.Buffered(1)),
                # Fused bias: grid-invariant -> resident, single-buffered.
                pl.BlockSpec((1, out_pad), lambda i: (0, 0),
                             pipeline_mode=pl.Buffered(1)),
            ],
            out_specs=pl.BlockSpec((tile, out_pad), lambda i: (i, 0)),
        ),
        compiler_params=pltpu.CompilerParams(
            dimension_semantics=("parallel",),   # RoI tiles are independent
            vmem_limit_bytes=vmem_bytes,
        ),
        cost_estimate=cost,
    )(x, w_fused, b_fused)

    cls_score = out[:, :n_cls]
    bbox_pred = out[:, n_cls:n_cls + n_reg]
    return cls_score, bbox_pred


if __name__ == "__main__":
    # Small, module-consistent shapes:
    #   N=8 RoIs, in_channels=4, roi_feat_size=7 -> D = 4*7*7 = 196
    #   num_classes=19, reg_class_agnostic=False -> reg out = 5*19 = 95
    #   fused out = 19 + 95 = 114 (-> padded 128)
    num_rois = 8
    in_channels = 4
    roi_feat_size = 7
    num_classes = 19
    out_dim_reg = 5 * num_classes
    d = in_channels * roi_feat_size * roi_feat_size

    key = jax.random.PRNGKey(0)
    kx, kc, kr = jax.random.split(key, 3)

    # NCHW input, matching PyTorch.
    x = jax.random.normal(
        kx, (num_rois, in_channels, roi_feat_size, roi_feat_size), dtype=jnp.float32
    )

    # init_weights(): normal(0, 0.01) / normal(0, 0.001), zero bias.
    w_cls = 0.01 * jax.random.normal(kc, (num_classes, d), dtype=jnp.float32)
    b_cls = jnp.zeros((num_classes,), dtype=jnp.float32)
    w_reg = 0.001 * jax.random.normal(kr, (out_dim_reg, d), dtype=jnp.float32)
    b_reg = jnp.zeros((out_dim_reg,), dtype=jnp.float32)

    # Init-time packing (hoisted out of the per-call path).
    w_fused, b_fused, n_cls, n_reg, _ = pack_bbox_head_params(
        w_cls, b_cls, w_reg, b_reg
    )

    cls_score, bbox_pred = bbox_head_rbbox_forward(
        x, w_fused, b_fused, n_cls=n_cls, n_reg=n_reg
    )
    jax.block_until_ready((cls_score, bbox_pred))

    assert cls_score.shape == (num_rois, num_classes)
    assert bbox_pred.shape == (num_rois, out_dim_reg)

    # Reference 1: same math with operands rounded to bf16 (kernel compute
    # dtype), f32 accumulation -> tight tolerance.
    x_flat = x.reshape(num_rois, d)
    xb = x_flat.astype(jnp.bfloat16).astype(jnp.float32)
    wcb = w_cls.astype(jnp.bfloat16).astype(jnp.float32)
    wrb = w_reg.astype(jnp.bfloat16).astype(jnp.float32)
    ref_cls_bf16 = xb @ wcb.T + b_cls
    ref_reg_bf16 = xb @ wrb.T + b_reg
    assert jnp.allclose(cls_score, ref_cls_bf16, atol=1e-3, rtol=1e-3)
    assert jnp.allclose(bbox_pred, ref_reg_bf16, atol=1e-3, rtol=1e-3)

    # Reference 2: full-f32 torch-style reference, looser tolerance (bf16 mul).
    ref_cls_f32 = x_flat @ w_cls.T + b_cls
    ref_reg_f32 = x_flat @ w_reg.T + b_reg
    assert jnp.allclose(cls_score, ref_cls_f32, atol=2e-2, rtol=2e-2)
    assert jnp.allclose(bbox_pred, ref_reg_f32, atol=2e-2, rtol=2e-2)

    print("KERNEL_OK")
</pallas_src>

<mosaic_0001>
module attributes {stable_mosaic.version = 11 : i64} {
  func.func @_bbox_head_kernel(%arg0: i32, %arg1: memref<8x196xf32, #tpu.memory_space<vmem>>, %arg2: memref<196x128xbf16, #tpu.memory_space<vmem>>, %arg3: memref<1x128xf32, #tpu.memory_space<vmem>>, %arg4: memref<8x128xf32, #tpu.memory_space<vmem>>) attributes {dimension_semantics = [#tpu.dimension_semantics<parallel>], iteration_bounds = array<i64: 1>, scalar_prefetch = 0 : i64, scratch_operands = 0 : i64, tpu.core_type = #tpu.core_type<tc>, window_params = [{transform_indices = @transform_0, window_bounds = array<i64: 8, 196>}, {pipeline_mode = #tpu.pipeline_mode<synchronous>, transform_indices = @transform_1, window_bounds = array<i64: 196, 128>}, {pipeline_mode = #tpu.pipeline_mode<synchronous>, transform_indices = @transform_2, window_bounds = array<i64: 1, 128>}, {transform_indices = @transform_3, window_bounds = array<i64: 8, 128>}]} {
    %c0 = arith.constant 0 : index
    %c0_0 = arith.constant 0 : index
    %0 = vector.load %arg1[%c0, %c0_0] : memref<8x196xf32, #tpu.memory_space<vmem>>, vector<8x196xf32>
    %1 = arith.truncf %0 : vector<8x196xf32> to vector<8x196xbf16>
    %c0_1 = arith.constant 0 : index
    %c0_2 = arith.constant 0 : index
    %2 = vector.load %arg2[%c0_1, %c0_2] : memref<196x128xbf16, #tpu.memory_space<vmem>>, vector<196x128xbf16>
    %cst = arith.constant dense<0.000000e+00> : vector<8x128xf32>
    %3 = tpu.matmul %1, %2, %cst {dimension_numbers = #tpu.dot_dimension_numbers<[1], [0], [0], [1], [0, 0, 1, 1], [], []>} : vector<8x196xbf16>, vector<196x128xbf16>, vector<8x128xf32> -> vector<8x128xf32>
    %c0_3 = arith.constant 0 : index
    %c0_4 = arith.constant 0 : index
    %4 = vector.load %arg3[%c0_3, %c0_4] : memref<1x128xf32, #tpu.memory_space<vmem>>, vector<1x128xf32>
    %5 = vector.broadcast %4 : vector<1x128xf32> to vector<8x128xf32>
    %6 = arith.addf %3, %5 : vector<8x128xf32>
    %c0_5 = arith.constant 0 : index
    %c0_6 = arith.constant 0 : index
    %7 = vector.load %arg4[%c0_5, %c0_6] : memref<8x128xf32, #tpu.memory_space<vmem>>, vector<8x128xf32>
    tpu.vector_store %arg4[%c0_5, %c0_6], %6 {strides = array<i32>} : memref<8x128xf32, #tpu.memory_space<vmem>>, vector<8x128xf32>,
    return
  }
  func.func @transform_0(%arg0: i32) -> (i32, i32) {
    %c0_i32 = arith.constant 0 : i32
    %c0_i32_0 = arith.constant 0 : i32
    return %arg0, %c0_i32 : i32, i32
  }
  func.func @transform_1(%arg0: i32) -> (i32, i32) {
    %c0_i32 = arith.constant 0 : i32
    %c0_i32_0 = arith.constant 0 : i32
    %c0_i32_1 = arith.constant 0 : i32
    return %c0_i32, %c0_i32_0 : i32, i32
  }
  func.func @transform_2(%arg0: i32) -> (i32, i32) {
    %c0_i32 = arith.constant 0 : i32
    %c0_i32_0 = arith.constant 0 : i32
    %c0_i32_1 = arith.constant 0 : i32
    return %c0_i32, %c0_i32_0 : i32, i32
  }
  func.func @transform_3(%arg0: i32) -> (i32, i32) {
    %c0_i32 = arith.constant 0 : i32
    %c0_i32_0 = arith.constant 0 : i32
    return %arg0, %c0_i32 : i32, i32
  }
}

</mosaic_0001>

<bundles_post_ra>
// kernel: bbox_head_rbbox_forward.1
= control target key start
LH: loop header
LB: loop body
LE: loop exit
PB: predicated region body
PF: predicated region fallthrough
CT: control target
= control target key end

     0   :  { %vm127_vm0 = vcmask 1041408   ;;  %vm123_vm1 = vcmask 556032   ;;  %s295_s1 = inlined_call_operand.vmem [shape: bf16[196,128], index: 1, kind: input, shape index: {}]   ;;  %s296_s0 = inlined_call_operand.vmem [shape: f32[8,196], index: 0, kind: input, shape index: {}]   ;;  %s297_s2 = inlined_call_operand.vmem [shape: f32[1,128], index: 2, kind: input, shape index: {}]   ;;  %s298_s3 = inlined_call_operand.vmem [shape: f32[8,128], index: 3, kind: output, shape index: {}]  }
   0x1   :  { %v218_v0 = vld [vmem:[%s295_s1 + $0x38] sm:$0xff]  ;;  %v43_v1 = vld [vmem:[%s295_s1 + $0x60] sm:$0x3]  ;;  %v217_v3 = vld [vmem:[%s295_s1 + $0x30] sm:$0xff] }
   0x2   :  { %v97_v2 = vunpack.c.l.b16 %v43_v1  ;;  %131 = vmatpush.bf16.msra.mxu0 %v218_v0  ;;  %v216_v6 = vld [vmem:[%s295_s1 + $0x28] sm:$0xff]  ;;  %v222_v7 = vld [vmem:[%s295_s1 + $0x58] sm:$0xff]  ;;  %v215_v8 = vld [vmem:[%s295_s1 + $0x20] sm:$0xff] }
   0x3   :  { %v221_v9 = vld [vmem:[%s295_s1 + $0x50] sm:$0xff]  ;;  %v214_v10 = vld [vmem:[%s295_s1 + $0x18] sm:$0xff]  ;;  %v220_v11 = vld [vmem:[%s295_s1 + $0x48] sm:$0xff] }
   0x4   :  { %v110_v4 = vpack.c.b16 %v97_v2, %v97_v2  ;;  %v213_v12 = vld [vmem:[%s295_s1 + $0x10] sm:$0xff]  ;;  %v219_v13 = vld [vmem:[%s295_s1 + $0x40] sm:$0xff]  ;;  %v16_v14 = vld [vmem:[%s296_s0 + $0x8] sm:$0xff] }
   0x5   :  { %v18_v15 = vpack.c.bf16 %v16_v14, %v16_v14  ;;  %v212_v16 = vld [vmem:[%s295_s1 + $0x8] sm:$0xff]  ;;  %v211_v17 = vld [vmem:[%s295_s1] sm:$0xff] }
   0x6   :  { %v129_v5 = vsel %vm127_vm0, %v110_v4, 0  ;;  %132 = vmatpush.bf16.msra.mxu0 %v217_v3  ;;  %v15_v18 = vld [vmem:[%s296_s0] sm:$0xff] }
   0x7   :  { %147 = vmatpush.bf16.msra.mxu1 %v129_v5  ;;  %v17_v19 = vpack.c.bf16 %v15_v18, %v15_v18  ;;  %v223_v21 = vld [vmem:[%s297_s2] ss:$0 sm:$0xff] }
   0xa   :  { %133 = vmatpush.bf16.msra.mxu0 %v216_v6 }
   0xb   :  { %148 = vmatpush.bf16.msra.mxu1 %v222_v7 }
   0xe   :  { %134 = vmatpush.bf16.msra.mxu0 %v215_v8 }
   0xf   :  { %149 = vmatpush.bf16.msra.mxu1 %v221_v9 }
  0x12   :  { %135 = vmatpush.bf16.msra.mxu0 %v214_v10 }
  0x13   :  { %150 = vmatpush.bf16.msra.mxu1 %v220_v11 }
  0x16   :  { %136 = vmatpush.bf16.msra.mxu0 %v213_v12 }
  0x17   :  { %151 = vmatpush.bf16.msra.mxu1 %v219_v13 }
  0x1a   :  { %210 = vmatmul.msk.bf16.vlgmr.msra.gmra.mxu1 %vm123_vm1, %v18_v15  ;;  %137 = vmatpush.bf16.msra.mxu0 %v212_v16 }
  0x1e   :  { %138 = vmatpush.bf16.msra.mxu0 %v211_v17 }
  0x21   :  { %139 = vmatmul.bf16.vlgmr.msra.gmra.mxu0 %v17_v19 }
  0x97   :  { %v153_v20 = vpop.f32.mrf.mxu1 }
  0x9e   :  { %v140_v22 = vpop.f32.mrf.mxu0 }
  0x9f   :  { %v155_v23 = vpop.f32.mrf.mxu1  ;;  %v141_v24 = vadd.f32 %v223_v21, %v140_v22 }
  0xa1   :  { %v154_v25 = vadd.f32 %v153_v20, %v141_v24 }
  0xa3   :  { %157 = vst [vmem:[%s298_s3] sm:$0xff] %v154_v25 }
  0xa6   :  { %v142_v26 = vpop.f32.mrf.mxu0 }

</bundles_post_ra>
